<compile_context>
chip_gen: v7x
topology: tpu7x:2x2x1
jax: 0.10.0
libtpu: 0.0.40
codegen_flags: <defaults>
</compile_context>

<pallas_src>
import jax
import jax.numpy as jnp
from jax.experimental import pallas as pl
from jax.experimental.pallas import tpu as pltpu

# ---- small, module-consistent shapes ----------------------------------------
B = 4                  # batch (== GRU "time" dim in this module)
NUM_FEATURES = 9       # len(csv_feature_dict)  (GRU "batch" dim)
FEAT_PAD = 16          # feature rows padded to a sublane-tile multiple
MAX_LEN = 24           # max_len (scaled down from 24*6)
LEN_PAD = 32           # GRU input size padded (zero columns/rows)
EMB = 32               # embedding_dim (scaled down from 512)
GPAD = 128             # per-gate lane padding (vreg-aligned gate blocks)
OUTLEN = 32            # outlen (scaled down from 500)
CLASS_N = 8            # class_n (scaled; original snippet has 0 labels)
IMG_C, IMG_H, IMG_W = 3, 16, 16
HW = IMG_H * IMG_W
IMG_FLAT = IMG_C * HW
OUT_PAD = 128          # lane-dense padded output width
BN_EPS = 1e-5


# ============================ fused forward kernel ============================
def fused_kernel(seq_ref, img_ref, gru_ref, wg_ref, wb_ref, b_ref, out_ref):
    """GRU recurrence + full head, single invocation, everything VMEM-resident.

    seq_ref : (B*FEAT_PAD, LEN_PAD) f32     zero-padded per-timestep feature blocks
    img_ref : (B, IMG_FLAT) f32             NCHW flattened (per-channel 256-lane blocks)
    gru_ref : (LEN_PAD+EMB, 3*GPAD) bf16    [rows 0:24 wih^T | 32:64 whh^T], gate-padded
    wg_ref  : (FEAT_PAD*EMB, 2*OUTLEN) bf16 GRU-branch fc (BN1 folded); pad rows zero
    wb_ref  : (2*OUTLEN + 128, 128) bf16    [fc1 (BN2 folded, 128-pad) | final (128-pad)]
    b_ref   : (8, 3*GPAD) f32               [bih | bhh | b_cat | b_fc1 | b_final |
                                             3 eff-branch weight rows (block-diag pos)]
    out_ref : (B, 128) f32                  logits in cols :CLASS_N, rest zero
    """
    FP, E, O = FEAT_PAD, EMB, OUTLEN
    f32, bf16 = jnp.float32, jnp.bfloat16

    # ---- GRU: nn.GRU(max_len, embedding_dim), PyTorch gate order (r, z, n), h0=0.
    # The recurrence runs over dim 0 of seq (length B) with "batch" = features,
    # exactly like the original module (batch_first=False GRU fed a (B, F, L) tensor).
    wih = gru_ref[0:LEN_PAD, :]                 # (32, 384) bf16, rows 24:32 zero
    whh = gru_ref[LEN_PAD:LEN_PAD + E, :]       # (32, 384) bf16
    bih = b_ref[0:1, :]                         # (1, 384) f32, gate-padded
    bhh = b_ref[1:2, :]                         # (1, 384) f32, gate-padded

    # Hoisted input projection for ALL timesteps in one MXU pass: (B*FP, 32)@(32, 384).
    gi_all = (jnp.dot(seq_ref[...].astype(bf16), wih, preferred_element_type=f32)
              + bih)                                                 # (B*FP, 384)

    h = jnp.zeros((FP, GPAD), f32)              # real hidden in lanes :E, pads stay 0
    hs = []
    for t in range(B):                          # static unroll; serial dependency chain
        gi = gi_all[t * FP:(t + 1) * FP, :]     # (FP, 384), 8-sublane-aligned slice
        gh = (jnp.dot(h[:, :E].astype(bf16), whh, preferred_element_type=f32)
              + bhh)                                                 # (FP, 384)
        rz = jax.nn.sigmoid(gi[:, :2 * GPAD] + gh[:, :2 * GPAD])     # fused r,z (EUP)
        r = rz[:, 0:GPAD]                                            # vreg-aligned
        z = rz[:, GPAD:2 * GPAD]
        n = jnp.tanh(gi[:, 2 * GPAD:3 * GPAD] + r * gh[:, 2 * GPAD:3 * GPAD])
        h = (1.0 - z) * n + z * h               # whole-vreg update, no lane rotates
        hs.append(h)                            # hidden state at "time" t

    # ---- GRU branch head: single (B, FP*E)@(FP*E, 2O) dot (BN1 folded, block col :O).
    hst = jnp.stack(hs, axis=0)                                      # (B, FP, 128)
    gflat = hst[:, :, :E].reshape(B, FP * E)                         # (B, 512), one copy
    cat = (jnp.dot(gflat.astype(bf16), wg_ref[...], preferred_element_type=f32)
           + b_ref[2:3, 0:2 * O])                                    # (B, 2O)

    # ---- eff branch (placeholder): global-average-pool + Linear, BN1 folded.
    # TODO(synk): timm `efficientnet_b3` (pretrained) backbone has no clean in-script
    # Pallas equivalent; approximated by global-average-pool + Linear(C -> outlen).
    img = img_ref[...]                                               # (B, 768) f32
    inv_hw = 1.0 / float(HW)
    for c in range(IMG_C):                      # 3 lane-aligned group reductions
        mc = jnp.sum(img[:, c * HW:(c + 1) * HW], axis=-1, keepdims=True) * inv_hw
        cat = cat + mc * b_ref[5 + c:6 + c, 0:2 * O]                 # (B,1)*(1,2O)

    h1 = jnp.maximum(cat, 0.0)                                       # ReLU(BN1(concat))

    # fc1 (BN2 folded), padded to 128 output lanes -> ReLU
    fcout = (jnp.dot(h1.astype(bf16), wb_ref[0:2 * O, :], preferred_element_type=f32)
             + b_ref[3:4, 0:OUT_PAD])                                # (B, 128)
    h2 = jnp.maximum(fcout, 0.0)

    # final linear, 128-lane padded output -> single unmasked store
    out_ref[...] = (jnp.dot(h2.astype(bf16), wb_ref[2 * O:2 * O + OUT_PAD, :],
                            preferred_element_type=f32) + b_ref[4:5, 0:OUT_PAD])


def _vmem_specs(n):
    return [pl.BlockSpec(memory_space=pltpu.MemorySpace.VMEM) for _ in range(n)]


# ================================ wrapper =====================================
@jax.jit
def mynet_forward(img, seq, params):
    # Pad features 9->16 and GRU input length 24->32 (zero rows/cols; padded-feature
    # weight rows are zero, so outputs are unchanged). Flatten to (B*FP, LEN_PAD).
    seqp = jnp.zeros((B, FEAT_PAD, LEN_PAD), jnp.float32)
    seqp = seqp.at[:, :NUM_FEATURES, :MAX_LEN].set(seq)
    seq2d = seqp.reshape(B * FEAT_PAD, LEN_PAD)
    img2d = img.reshape(B, IMG_FLAT)                    # NCHW -> (B, C*H*W)
    out_pad = pl.pallas_call(
        fused_kernel,
        out_shape=jax.ShapeDtypeStruct((B, OUT_PAD), jnp.float32),
        in_specs=_vmem_specs(6),
        out_specs=pl.BlockSpec(memory_space=pltpu.MemorySpace.VMEM),
    )(seq2d, img2d, params["gru_w"], params["head_wg"],
      params["head_wb"], params["bias"])
    return out_pad[:, :CLASS_N]


def make_params(key):
    ks = jax.random.split(key, 6)
    s = 0.05
    O, F, E, L = OUTLEN, NUM_FEATURES, EMB, MAX_LEN

    # ---- raw (PyTorch-equivalent) parameters ---------------------------------
    wih_t = jax.random.normal(ks[0], (L, 3 * E), jnp.float32) * s   # weight_ih_l0^T
    whh_t = jax.random.normal(ks[1], (E, 3 * E), jnp.float32) * s   # weight_hh_l0^T
    bih = jnp.zeros((3 * E,), jnp.float32)
    bhh = jnp.zeros((3 * E,), jnp.float32)
    w_gfc = jax.random.normal(ks[2], (F * E, O), jnp.float32) * s   # myGru.fc^T
    b_gfc = jnp.zeros((O,), jnp.float32)
    # TODO(synk): efficientnet_b3 approximated by global-average-pool + Linear(C->outlen).
    w_eff = jax.random.normal(ks[3], (IMG_C, O), jnp.float32) * s
    b_eff = jnp.zeros((O,), jnp.float32)
    w_fc1 = jax.random.normal(ks[4], (2 * O, O), jnp.float32) * s
    b_fc1 = jnp.zeros((O,), jnp.float32)
    w_fin = jax.random.normal(ks[5], (O, CLASS_N), jnp.float32) * s
    b_fin = jnp.zeros((CLASS_N,), jnp.float32)
    # BatchNorm1d (inference mode, default init: gamma=1, beta=0, mean=0, var=1)
    g1 = jnp.ones((2 * O,)); be1 = jnp.zeros((2 * O,))
    m1 = jnp.zeros((2 * O,)); v1 = jnp.ones((2 * O,))
    g2 = jnp.ones((O,)); be2 = jnp.zeros((O,))
    m2 = jnp.zeros((O,)); v2 = jnp.ones((O,))

    # ---- fold BN1 into the two branch linears (exact in inference mode) ------
    sc1 = g1 / jnp.sqrt(v1 + BN_EPS)                                  # (2O,)
    w_g_f = w_gfc * sc1[:O][None, :]                                  # (F*E, O)
    b_g_f = (b_gfc - m1[:O]) * sc1[:O] + be1[:O]
    w_e_f = w_eff * sc1[O:][None, :]                                  # (C, O)
    b_e_f = (b_eff - m1[O:]) * sc1[O:] + be1[O:]

    # ---- fold BN2 into fc1 ----------------------------------------------------
    sc2 = g2 / jnp.sqrt(v2 + BN_EPS)
    w_fc1_f = w_fc1 * sc2[None, :]
    b_fc1_f = (b_fc1 - m2) * sc2 + be2

    # ---- GRU weight slab: bf16, gate blocks padded to 128-lane boundaries -----
    gru_w = jnp.zeros((LEN_PAD + E, 3 * GPAD), jnp.float32)           # (64, 384)
    for g in range(3):
        gru_w = gru_w.at[:L, g * GPAD:g * GPAD + E].set(wih_t[:, g * E:(g + 1) * E])
        gru_w = gru_w.at[LEN_PAD:LEN_PAD + E,
                         g * GPAD:g * GPAD + E].set(whh_t[:, g * E:(g + 1) * E])
    gru_w = gru_w.astype(jnp.bfloat16)

    # ---- GRU-branch head weight (BN1 folded); rows of padded features stay 0 --
    head_wg = jnp.zeros((FEAT_PAD * E, 2 * O), jnp.float32)           # (512, 64)
    head_wg = head_wg.at[:F * E, :O].set(w_g_f)
    head_wg = head_wg.astype(jnp.bfloat16)

    # ---- fc1 (BN2 folded) + final, 128-lane padded, bf16 ----------------------
    head_wb = jnp.zeros((2 * O + OUT_PAD, OUT_PAD), jnp.float32)      # (192, 128)
    head_wb = head_wb.at[:2 * O, :O].set(w_fc1_f)
    head_wb = head_wb.at[2 * O:2 * O + O, :CLASS_N].set(w_fin)
    head_wb = head_wb.astype(jnp.bfloat16)

    # ---- single f32 slab: GRU biases (gate-padded), head biases, eff weights --
    bias = jnp.zeros((8, 3 * GPAD), jnp.float32)                      # (8, 384)
    for g in range(3):
        bias = bias.at[0, g * GPAD:g * GPAD + E].set(bih[g * E:(g + 1) * E])
        bias = bias.at[1, g * GPAD:g * GPAD + E].set(bhh[g * E:(g + 1) * E])
    bias = bias.at[2, :O].set(b_g_f)
    bias = bias.at[2, O:2 * O].set(b_e_f)
    bias = bias.at[3, :O].set(b_fc1_f)
    bias = bias.at[4, :CLASS_N].set(b_fin)
    bias = bias.at[5:8, O:2 * O].set(w_e_f)       # eff-branch weight rows, block-diag pos
    return {"gru_w": gru_w, "head_wg": head_wg, "head_wb": head_wb, "bias": bias}


if __name__ == "__main__":
    key = jax.random.PRNGKey(0)
    k_img, k_seq, k_par = jax.random.split(key, 3)
    img = jax.random.normal(k_img, (B, IMG_C, IMG_H, IMG_W), jnp.float32)   # NCHW
    seq = jax.random.normal(k_seq, (B, NUM_FEATURES, MAX_LEN), jnp.float32)
    params = make_params(k_par)

    out = mynet_forward(img, seq, params)
    out = jax.block_until_ready(out)
    assert out.shape == (B, CLASS_N), out.shape
    assert bool(jnp.all(jnp.isfinite(out)))
    print("KERNEL_OK")
</pallas_src>

<mosaic_0001>
module attributes {stable_mosaic.version = 11 : i64} {
  func.func @fused_kernel(%arg0: memref<64x32xf32, #tpu.memory_space<vmem>>, %arg1: memref<4x768xf32, #tpu.memory_space<vmem>>, %arg2: memref<64x384xbf16, #tpu.memory_space<vmem>>, %arg3: memref<512x64xbf16, #tpu.memory_space<vmem>>, %arg4: memref<192x128xbf16, #tpu.memory_space<vmem>>, %arg5: memref<8x384xf32, #tpu.memory_space<vmem>>, %arg6: memref<4x128xf32, #tpu.memory_space<vmem>>) attributes {dimension_semantics = [], scalar_prefetch = 0 : i64, scratch_operands = 0 : i64, tpu.core_type = #tpu.core_type<tc>} {
    %c0 = arith.constant 0 : index
    %c0_0 = arith.constant 0 : index
    %0 = vector.load %arg2[%c0, %c0_0] : memref<64x384xbf16, #tpu.memory_space<vmem>>, vector<32x384xbf16>
    %c32 = arith.constant 32 : index
    %c0_1 = arith.constant 0 : index
    %1 = vector.load %arg2[%c32, %c0_1] : memref<64x384xbf16, #tpu.memory_space<vmem>>, vector<32x384xbf16>
    %c0_2 = arith.constant 0 : index
    %c0_3 = arith.constant 0 : index
    %2 = vector.load %arg5[%c0_2, %c0_3] : memref<8x384xf32, #tpu.memory_space<vmem>>, vector<1x384xf32>
    %c1 = arith.constant 1 : index
    %c0_4 = arith.constant 0 : index
    %3 = vector.load %arg5[%c1, %c0_4] : memref<8x384xf32, #tpu.memory_space<vmem>>, vector<1x384xf32>
    %c0_5 = arith.constant 0 : index
    %c0_6 = arith.constant 0 : index
    %4 = vector.load %arg0[%c0_5, %c0_6] : memref<64x32xf32, #tpu.memory_space<vmem>>, vector<64x32xf32>
    %5 = arith.truncf %4 : vector<64x32xf32> to vector<64x32xbf16>
    %cst = arith.constant dense<0.000000e+00> : vector<64x384xf32>
    %6 = tpu.matmul %5, %0, %cst {dimension_numbers = #tpu.dot_dimension_numbers<[1], [0], [0], [1], [0, 0, 1, 1], [], []>} : vector<64x32xbf16>, vector<32x384xbf16>, vector<64x384xf32> -> vector<64x384xf32>
    %7 = vector.broadcast %2 : vector<1x384xf32> to vector<64x384xf32>
    %8 = arith.addf %6, %7 : vector<64x384xf32>
    %cst_7 = arith.constant 0.000000e+00 : f32
    %9 = vector.broadcast %cst_7 : f32 to vector<16x128xf32>
    %10 = vector.extract_strided_slice %8 {offsets = [0, 0], sizes = [16, 384], strides = [1, 1]} : vector<64x384xf32> to vector<16x384xf32>
    %11 = vector.extract_strided_slice %9 {offsets = [0, 0], sizes = [16, 32], strides = [1, 1]} : vector<16x128xf32> to vector<16x32xf32>
    %12 = arith.truncf %11 : vector<16x32xf32> to vector<16x32xbf16>
    %cst_8 = arith.constant dense<0.000000e+00> : vector<16x384xf32>
    %13 = tpu.matmul %12, %1, %cst_8 {dimension_numbers = #tpu.dot_dimension_numbers<[1], [0], [0], [1], [0, 0, 1, 1], [], []>} : vector<16x32xbf16>, vector<32x384xbf16>, vector<16x384xf32> -> vector<16x384xf32>
    %14 = vector.broadcast %3 : vector<1x384xf32> to vector<16x384xf32>
    %15 = arith.addf %13, %14 : vector<16x384xf32>
    %16 = vector.extract_strided_slice %10 {offsets = [0, 0], sizes = [16, 256], strides = [1, 1]} : vector<16x384xf32> to vector<16x256xf32>
    %17 = vector.extract_strided_slice %15 {offsets = [0, 0], sizes = [16, 256], strides = [1, 1]} : vector<16x384xf32> to vector<16x256xf32>
    %18 = arith.addf %16, %17 : vector<16x256xf32>
    %19 = arith.negf %18 : vector<16x256xf32>
    %20 = math.exp %19 : vector<16x256xf32>
    %cst_9 = arith.constant 1.000000e+00 : f32
    %21 = vector.broadcast %cst_9 : f32 to vector<16x256xf32>
    %22 = arith.addf %21, %20 : vector<16x256xf32>
    %23 = arith.divf %21, %22 : vector<16x256xf32>
    %24 = vector.extract_strided_slice %23 {offsets = [0, 0], sizes = [16, 128], strides = [1, 1]} : vector<16x256xf32> to vector<16x128xf32>
    %25 = vector.extract_strided_slice %23 {offsets = [0, 128], sizes = [16, 128], strides = [1, 1]} : vector<16x256xf32> to vector<16x128xf32>
    %26 = vector.extract_strided_slice %10 {offsets = [0, 256], sizes = [16, 128], strides = [1, 1]} : vector<16x384xf32> to vector<16x128xf32>
    %27 = vector.extract_strided_slice %15 {offsets = [0, 256], sizes = [16, 128], strides = [1, 1]} : vector<16x384xf32> to vector<16x128xf32>
    %28 = arith.mulf %24, %27 : vector<16x128xf32>
    %29 = arith.addf %26, %28 : vector<16x128xf32>
    %30 = math.tanh %29 : vector<16x128xf32>
    %cst_10 = arith.constant 1.000000e+00 : f32
    %31 = vector.broadcast %cst_10 : f32 to vector<16x128xf32>
    %32 = arith.subf %31, %25 : vector<16x128xf32>
    %33 = arith.mulf %32, %30 : vector<16x128xf32>
    %34 = arith.mulf %25, %9 : vector<16x128xf32>
    %35 = arith.addf %33, %34 : vector<16x128xf32>
    %36 = vector.extract_strided_slice %8 {offsets = [16, 0], sizes = [16, 384], strides = [1, 1]} : vector<64x384xf32> to vector<16x384xf32>
    %37 = vector.extract_strided_slice %35 {offsets = [0, 0], sizes = [16, 32], strides = [1, 1]} : vector<16x128xf32> to vector<16x32xf32>
    %38 = arith.truncf %37 : vector<16x32xf32> to vector<16x32xbf16>
    %cst_11 = arith.constant dense<0.000000e+00> : vector<16x384xf32>
    %39 = tpu.matmul %38, %1, %cst_11 {dimension_numbers = #tpu.dot_dimension_numbers<[1], [0], [0], [1], [0, 0, 1, 1], [], []>} : vector<16x32xbf16>, vector<32x384xbf16>, vector<16x384xf32> -> vector<16x384xf32>
    %40 = vector.broadcast %3 : vector<1x384xf32> to vector<16x384xf32>
    %41 = arith.addf %39, %40 : vector<16x384xf32>
    %42 = vector.extract_strided_slice %36 {offsets = [0, 0], sizes = [16, 256], strides = [1, 1]} : vector<16x384xf32> to vector<16x256xf32>
    %43 = vector.extract_strided_slice %41 {offsets = [0, 0], sizes = [16, 256], strides = [1, 1]} : vector<16x384xf32> to vector<16x256xf32>
    %44 = arith.addf %42, %43 : vector<16x256xf32>
    %45 = arith.negf %44 : vector<16x256xf32>
    %46 = math.exp %45 : vector<16x256xf32>
    %cst_12 = arith.constant 1.000000e+00 : f32
    %47 = vector.broadcast %cst_12 : f32 to vector<16x256xf32>
    %48 = arith.addf %47, %46 : vector<16x256xf32>
    %49 = arith.divf %47, %48 : vector<16x256xf32>
    %50 = vector.extract_strided_slice %49 {offsets = [0, 0], sizes = [16, 128], strides = [1, 1]} : vector<16x256xf32> to vector<16x128xf32>
    %51 = vector.extract_strided_slice %49 {offsets = [0, 128], sizes = [16, 128], strides = [1, 1]} : vector<16x256xf32> to vector<16x128xf32>
    %52 = vector.extract_strided_slice %36 {offsets = [0, 256], sizes = [16, 128], strides = [1, 1]} : vector<16x384xf32> to vector<16x128xf32>
    %53 = vector.extract_strided_slice %41 {offsets = [0, 256], sizes = [16, 128], strides = [1, 1]} : vector<16x384xf32> to vector<16x128xf32>
    %54 = arith.mulf %50, %53 : vector<16x128xf32>
    %55 = arith.addf %52, %54 : vector<16x128xf32>
    %56 = math.tanh %55 : vector<16x128xf32>
    %cst_13 = arith.constant 1.000000e+00 : f32
    %57 = vector.broadcast %cst_13 : f32 to vector<16x128xf32>
    %58 = arith.subf %57, %51 : vector<16x128xf32>
    %59 = arith.mulf %58, %56 : vector<16x128xf32>
    %60 = arith.mulf %51, %35 : vector<16x128xf32>
    %61 = arith.addf %59, %60 : vector<16x128xf32>
    %62 = vector.extract_strided_slice %8 {offsets = [32, 0], sizes = [16, 384], strides = [1, 1]} : vector<64x384xf32> to vector<16x384xf32>
    %63 = vector.extract_strided_slice %61 {offsets = [0, 0], sizes = [16, 32], strides = [1, 1]} : vector<16x128xf32> to vector<16x32xf32>
    %64 = arith.truncf %63 : vector<16x32xf32> to vector<16x32xbf16>
    %cst_14 = arith.constant dense<0.000000e+00> : vector<16x384xf32>
    %65 = tpu.matmul %64, %1, %cst_14 {dimension_numbers = #tpu.dot_dimension_numbers<[1], [0], [0], [1], [0, 0, 1, 1], [], []>} : vector<16x32xbf16>, vector<32x384xbf16>, vector<16x384xf32> -> vector<16x384xf32>
    %66 = vector.broadcast %3 : vector<1x384xf32> to vector<16x384xf32>
    %67 = arith.addf %65, %66 : vector<16x384xf32>
    %68 = vector.extract_strided_slice %62 {offsets = [0, 0], sizes = [16, 256], strides = [1, 1]} : vector<16x384xf32> to vector<16x256xf32>
    %69 = vector.extract_strided_slice %67 {offsets = [0, 0], sizes = [16, 256], strides = [1, 1]} : vector<16x384xf32> to vector<16x256xf32>
    %70 = arith.addf %68, %69 : vector<16x256xf32>
    %71 = arith.negf %70 : vector<16x256xf32>
    %72 = math.exp %71 : vector<16x256xf32>
    %cst_15 = arith.constant 1.000000e+00 : f32
    %73 = vector.broadcast %cst_15 : f32 to vector<16x256xf32>
    %74 = arith.addf %73, %72 : vector<16x256xf32>
    %75 = arith.divf %73, %74 : vector<16x256xf32>
    %76 = vector.extract_strided_slice %75 {offsets = [0, 0], sizes = [16, 128], strides = [1, 1]} : vector<16x256xf32> to vector<16x128xf32>
    %77 = vector.extract_strided_slice %75 {offsets = [0, 128], sizes = [16, 128], strides = [1, 1]} : vector<16x256xf32> to vector<16x128xf32>
    %78 = vector.extract_strided_slice %62 {offsets = [0, 256], sizes = [16, 128], strides = [1, 1]} : vector<16x384xf32> to vector<16x128xf32>
    %79 = vector.extract_strided_slice %67 {offsets = [0, 256], sizes = [16, 128], strides = [1, 1]} : vector<16x384xf32> to vector<16x128xf32>
    %80 = arith.mulf %76, %79 : vector<16x128xf32>
    %81 = arith.addf %78, %80 : vector<16x128xf32>
    %82 = math.tanh %81 : vector<16x128xf32>
    %cst_16 = arith.constant 1.000000e+00 : f32
    %83 = vector.broadcast %cst_16 : f32 to vector<16x128xf32>
    %84 = arith.subf %83, %77 : vector<16x128xf32>
    %85 = arith.mulf %84, %82 : vector<16x128xf32>
    %86 = arith.mulf %77, %61 : vector<16x128xf32>
    %87 = arith.addf %85, %86 : vector<16x128xf32>
    %88 = vector.extract_strided_slice %8 {offsets = [48, 0], sizes = [16, 384], strides = [1, 1]} : vector<64x384xf32> to vector<16x384xf32>
    %89 = vector.extract_strided_slice %87 {offsets = [0, 0], sizes = [16, 32], strides = [1, 1]} : vector<16x128xf32> to vector<16x32xf32>
    %90 = arith.truncf %89 : vector<16x32xf32> to vector<16x32xbf16>
    %cst_17 = arith.constant dense<0.000000e+00> : vector<16x384xf32>
    %91 = tpu.matmul %90, %1, %cst_17 {dimension_numbers = #tpu.dot_dimension_numbers<[1], [0], [0], [1], [0, 0, 1, 1], [], []>} : vector<16x32xbf16>, vector<32x384xbf16>, vector<16x384xf32> -> vector<16x384xf32>
    %92 = vector.broadcast %3 : vector<1x384xf32> to vector<16x384xf32>
    %93 = arith.addf %91, %92 : vector<16x384xf32>
    %94 = vector.extract_strided_slice %88 {offsets = [0, 0], sizes = [16, 256], strides = [1, 1]} : vector<16x384xf32> to vector<16x256xf32>
    %95 = vector.extract_strided_slice %93 {offsets = [0, 0], sizes = [16, 256], strides = [1, 1]} : vector<16x384xf32> to vector<16x256xf32>
    %96 = arith.addf %94, %95 : vector<16x256xf32>
    %97 = arith.negf %96 : vector<16x256xf32>
    %98 = math.exp %97 : vector<16x256xf32>
    %cst_18 = arith.constant 1.000000e+00 : f32
    %99 = vector.broadcast %cst_18 : f32 to vector<16x256xf32>
    %100 = arith.addf %99, %98 : vector<16x256xf32>
    %101 = arith.divf %99, %100 : vector<16x256xf32>
    %102 = vector.extract_strided_slice %101 {offsets = [0, 0], sizes = [16, 128], strides = [1, 1]} : vector<16x256xf32> to vector<16x128xf32>
    %103 = vector.extract_strided_slice %101 {offsets = [0, 128], sizes = [16, 128], strides = [1, 1]} : vector<16x256xf32> to vector<16x128xf32>
    %104 = vector.extract_strided_slice %88 {offsets = [0, 256], sizes = [16, 128], strides = [1, 1]} : vector<16x384xf32> to vector<16x128xf32>
    %105 = vector.extract_strided_slice %93 {offsets = [0, 256], sizes = [16, 128], strides = [1, 1]} : vector<16x384xf32> to vector<16x128xf32>
    %106 = arith.mulf %102, %105 : vector<16x128xf32>
    %107 = arith.addf %104, %106 : vector<16x128xf32>
    %108 = math.tanh %107 : vector<16x128xf32>
    %cst_19 = arith.constant 1.000000e+00 : f32
    %109 = vector.broadcast %cst_19 : f32 to vector<16x128xf32>
    %110 = arith.subf %109, %103 : vector<16x128xf32>
    %111 = arith.mulf %110, %108 : vector<16x128xf32>
    %112 = arith.mulf %103, %87 : vector<16x128xf32>
    %113 = arith.addf %111, %112 : vector<16x128xf32>
    %114 = vector.shape_cast %35 : vector<16x128xf32> to vector<1x16x128xf32>
    %115 = vector.shape_cast %61 : vector<16x128xf32> to vector<1x16x128xf32>
    %116 = vector.shape_cast %87 : vector<16x128xf32> to vector<1x16x128xf32>
    %117 = vector.shape_cast %113 : vector<16x128xf32> to vector<1x16x128xf32>
    %118 = tpu.concatenate %114, %115, %116, %117 in 0 : vector<1x16x128xf32>, vector<1x16x128xf32>, vector<1x16x128xf32>, vector<1x16x128xf32> -> vector<4x16x128xf32>
    %119 = vector.extract_strided_slice %118 {offsets = [0, 0, 0], sizes = [4, 16, 32], strides = [1, 1, 1]} : vector<4x16x128xf32> to vector<4x16x32xf32>
    %120 = vector.shape_cast %119 : vector<4x16x32xf32> to vector<4x512xf32>
    %121 = arith.truncf %120 : vector<4x512xf32> to vector<4x512xbf16>
    %c0_20 = arith.constant 0 : index
    %c0_21 = arith.constant 0 : index
    %122 = vector.load %arg3[%c0_20, %c0_21] : memref<512x64xbf16, #tpu.memory_space<vmem>>, vector<512x64xbf16>
    %cst_22 = arith.constant dense<0.000000e+00> : vector<4x64xf32>
    %123 = tpu.matmul %121, %122, %cst_22 {dimension_numbers = #tpu.dot_dimension_numbers<[1], [0], [0], [1], [0, 0, 1, 1], [], []>} : vector<4x512xbf16>, vector<512x64xbf16>, vector<4x64xf32> -> vector<4x64xf32>
    %c2 = arith.constant 2 : index
    %c0_23 = arith.constant 0 : index
    %124 = vector.load %arg5[%c2, %c0_23] : memref<8x384xf32, #tpu.memory_space<vmem>>, vector<1x64xf32>
    %125 = vector.broadcast %124 : vector<1x64xf32> to vector<4x64xf32>
    %126 = arith.addf %123, %125 : vector<4x64xf32>
    %c0_24 = arith.constant 0 : index
    %c0_25 = arith.constant 0 : index
    %127 = vector.load %arg1[%c0_24, %c0_25] : memref<4x768xf32, #tpu.memory_space<vmem>>, vector<4x768xf32>
    %128 = vector.extract_strided_slice %127 {offsets = [0, 0], sizes = [4, 256], strides = [1, 1]} : vector<4x768xf32> to vector<4x256xf32>
    %cst_26 = arith.constant dense<0.000000e+00> : vector<4xf32>
    %129 = vector.multi_reduction <add>, %128, %cst_26 [1] : vector<4x256xf32> to vector<4xf32>
    %130 = vector.shape_cast %129 : vector<4xf32> to vector<4x1xf32>
    %cst_27 = arith.constant 3.906250e-03 : f32
    %131 = vector.broadcast %cst_27 : f32 to vector<4x1xf32>
    %132 = arith.mulf %130, %131 : vector<4x1xf32>
    %c5 = arith.constant 5 : index
    %c0_28 = arith.constant 0 : index
    %133 = vector.load %arg5[%c5, %c0_28] : memref<8x384xf32, #tpu.memory_space<vmem>>, vector<1x64xf32>
    %134 = vector.broadcast %132 : vector<4x1xf32> to vector<4x64xf32>
    %135 = vector.broadcast %133 : vector<1x64xf32> to vector<4x64xf32>
    %136 = arith.mulf %134, %135 : vector<4x64xf32>
    %137 = arith.addf %126, %136 : vector<4x64xf32>
    %138 = vector.extract_strided_slice %127 {offsets = [0, 256], sizes = [4, 256], strides = [1, 1]} : vector<4x768xf32> to vector<4x256xf32>
    %cst_29 = arith.constant dense<0.000000e+00> : vector<4xf32>
    %139 = vector.multi_reduction <add>, %138, %cst_29 [1] : vector<4x256xf32> to vector<4xf32>
    %140 = vector.shape_cast %139 : vector<4xf32> to vector<4x1xf32>
    %cst_30 = arith.constant 3.906250e-03 : f32
    %141 = vector.broadcast %cst_30 : f32 to vector<4x1xf32>
    %142 = arith.mulf %140, %141 : vector<4x1xf32>
    %c6 = arith.constant 6 : index
    %c0_31 = arith.constant 0 : index
    %143 = vector.load %arg5[%c6, %c0_31] : memref<8x384xf32, #tpu.memory_space<vmem>>, vector<1x64xf32>
    %144 = vector.broadcast %142 : vector<4x1xf32> to vector<4x64xf32>
    %145 = vector.broadcast %143 : vector<1x64xf32> to vector<4x64xf32>
    %146 = arith.mulf %144, %145 : vector<4x64xf32>
    %147 = arith.addf %137, %146 : vector<4x64xf32>
    %148 = vector.extract_strided_slice %127 {offsets = [0, 512], sizes = [4, 256], strides = [1, 1]} : vector<4x768xf32> to vector<4x256xf32>
    %cst_32 = arith.constant dense<0.000000e+00> : vector<4xf32>
    %149 = vector.multi_reduction <add>, %148, %cst_32 [1] : vector<4x256xf32> to vector<4xf32>
    %150 = vector.shape_cast %149 : vector<4xf32> to vector<4x1xf32>
    %cst_33 = arith.constant 3.906250e-03 : f32
    %151 = vector.broadcast %cst_33 : f32 to vector<4x1xf32>
    %152 = arith.mulf %150, %151 : vector<4x1xf32>
    %c7 = arith.constant 7 : index
    %c0_34 = arith.constant 0 : index
    %153 = vector.load %arg5[%c7, %c0_34] : memref<8x384xf32, #tpu.memory_space<vmem>>, vector<1x64xf32>
    %154 = vector.broadcast %152 : vector<4x1xf32> to vector<4x64xf32>
    %155 = vector.broadcast %153 : vector<1x64xf32> to vector<4x64xf32>
    %156 = arith.mulf %154, %155 : vector<4x64xf32>
    %157 = arith.addf %147, %156 : vector<4x64xf32>
    %cst_35 = arith.constant 0.000000e+00 : f32
    %158 = vector.broadcast %cst_35 : f32 to vector<4x64xf32>
    %159 = arith.maximumf %157, %158 : vector<4x64xf32>
    %160 = arith.truncf %159 : vector<4x64xf32> to vector<4x64xbf16>
    %c0_36 = arith.constant 0 : index
    %c0_37 = arith.constant 0 : index
    %161 = vector.load %arg4[%c0_36, %c0_37] : memref<192x128xbf16, #tpu.memory_space<vmem>>, vector<64x128xbf16>
    %cst_38 = arith.constant dense<0.000000e+00> : vector<4x128xf32>
    %162 = tpu.matmul %160, %161, %cst_38 {dimension_numbers = #tpu.dot_dimension_numbers<[1], [0], [0], [1], [0, 0, 1, 1], [], []>} : vector<4x64xbf16>, vector<64x128xbf16>, vector<4x128xf32> -> vector<4x128xf32>
    %c3 = arith.constant 3 : index
    %c0_39 = arith.constant 0 : index
    %163 = vector.load %arg5[%c3, %c0_39] : memref<8x384xf32, #tpu.memory_space<vmem>>, vector<1x128xf32>
    %164 = vector.broadcast %163 : vector<1x128xf32> to vector<4x128xf32>
    %165 = arith.addf %162, %164 : vector<4x128xf32>
    %cst_40 = arith.constant 0.000000e+00 : f32
    %166 = vector.broadcast %cst_40 : f32 to vector<4x128xf32>
    %167 = arith.maximumf %165, %166 : vector<4x128xf32>
    %168 = arith.truncf %167 : vector<4x128xf32> to vector<4x128xbf16>
    %c64 = arith.constant 64 : index
    %c0_41 = arith.constant 0 : index
    %169 = vector.load %arg4[%c64, %c0_41] : memref<192x128xbf16, #tpu.memory_space<vmem>>, vector<128x128xbf16>
    %cst_42 = arith.constant dense<0.000000e+00> : vector<4x128xf32>
    %170 = tpu.matmul %168, %169, %cst_42 {dimension_numbers = #tpu.dot_dimension_numbers<[1], [0], [0], [1], [0, 0, 1, 1], [], []>} : vector<4x128xbf16>, vector<128x128xbf16>, vector<4x128xf32> -> vector<4x128xf32>
    %c4 = arith.constant 4 : index
    %c0_43 = arith.constant 0 : index
    %171 = vector.load %arg5[%c4, %c0_43] : memref<8x384xf32, #tpu.memory_space<vmem>>, vector<1x128xf32>
    %172 = vector.broadcast %171 : vector<1x128xf32> to vector<4x128xf32>
    %173 = arith.addf %170, %172 : vector<4x128xf32>
    %c0_44 = arith.constant 0 : index
    %c0_45 = arith.constant 0 : index
    %174 = vector.load %arg6[%c0_44, %c0_45] : memref<4x128xf32, #tpu.memory_space<vmem>>, vector<4x128xf32>
    tpu.vector_store %arg6[%c0_44, %c0_45], %173 {strides = array<i32>} : memref<4x128xf32, #tpu.memory_space<vmem>>, vector<4x128xf32>,
    return
  }
}

</mosaic_0001>

<bundles_post_ra>
// kernel: mynet_forward.1
= control target key start
LH: loop header
LB: loop body
LE: loop exit
PB: predicated region body
PF: predicated region fallthrough
CT: control target
= control target key end

     0   :  { %v2099_v2 = vmov 0   ;;  %vm104_vm0 = vcmask 261120   ;;  %v2100_v23 = vmov 0.0   ;;  %vm2101_vm1 = vmmov 0   ;;  %s2644_s0 = inlined_call_operand.vmem [shape: f32[64,32], index: 0, kind: input, shape index: {}]   ;;  %s2645_s1 = inlined_call_operand.vmem [shape: f32[4,768], index: 1, kind: input, shape index: {}]   ;;  %s2646_s2 = inlined_call_operand.vmem [shape: bf16[64,384], index: 2, kind: input, shape index: {}]   ;;  %s2647_s3 = inlined_call_operand.vmem [shape: bf16[512,64], index: 3, kind: input, shape index: {}]   ;;  %s2648_s4 = inlined_call_operand.vmem [shape: bf16[192,128], index: 4, kind: input, shape index: {}]   ;;  %s2649_s5 = inlined_call_operand.vmem [shape: f32[8,384], index: 5, kind: input, shape index: {}]   ;;  %s2650_s6 = inlined_call_operand.hbm [shape: f32[4,128], index: 6, kind: output, shape index: {}]  }
   0x1   :  { %v1932_v0 = vld [vmem:[%s2646_s2 + $0x4] ss:$12 sps:$4 sm:$0xff]   ;;  %v1934_v1 = vld [vmem:[%s2646_s2] ss:$12 sps:$4 sm:$0xff]   ;;  %149 = vmatprep.mubr.bf16.mxu0 %v2099_v2  ;;  %169 = vmatprep.mubr.bf16.mxu1 %v2099_v2  ;;  %v1935_v3 = vld [vmem:[%s2646_s2 + $0x1c] ss:$12 sps:$4 sm:$0xff]  }
   0x2   :  { %117 = vmatprep.subr.bf16.mxu0 %v1932_v0  ;;  %v1937_v4 = vld [vmem:[%s2646_s2 + $0x18] ss:$12 sps:$4 sm:$0xff]   ;;  %1841 = vmatprep.subr.bf16.mxu1 %v1932_v0  ;;  %v45_v6 = vld [vmem:[%s2644_s0 + $0x8] sm:$0xff]  ;;  %v2166_v7 = vld [vmem:[%s2646_s2 + $0x34] ss:$12 sps:$4 sm:$0xff]  }
   0x3   :  { %v44_v5 = vld [vmem:[%s2644_s0] sm:$0xff]  ;;  %118 = vmatpush1.bf16.msra.mxu0 %v1934_v1  ;;  %1843 = vmatpush1.bf16.msra.mxu1 %v1934_v1  ;;  %v49_v9 = vld [vmem:[%s2644_s0 + $0x28] sm:$0xff]  ;;  %v2177_v12 = vld [vmem:[%s2646_s2 + $0x30] ss:$12 sps:$4 sm:$0xff]  }
   0x4   :  { %119 = vmatprep.subr.bf16.mxu0 %v1935_v3  ;;  %1842 = vmatprep.subr.bf16.mxu1 %v1935_v3  ;;  %v48_v8 = vld [vmem:[%s2644_s0 + $0x20] sm:$0xff]  ;;  %v52_v10 = vpack.c.bf16 %v45_v6, %v44_v5  ;;  %v2183_v13 = vld [vmem:[%s2646_s2 + $0x4c] ss:$12 sps:$4 sm:$0xff]   ;;  %v1944_v14 = vld [vmem:[%s2646_s2 + $0x8] ss:$12 sps:$4 sm:$0xff]  }
   0x5   :  { %v54_v11 = vpack.c.bf16 %v49_v9, %v48_v8  ;;  %v46_v15 = vld [vmem:[%s2644_s0 + $0x10] sm:$0xff]  ;;  %v47_v16 = vld [vmem:[%s2644_s0 + $0x18] sm:$0xff]  ;;  %v1945_v19 = vld [vmem:[%s2646_s2 + $0x20] ss:$12 sps:$4 sm:$0xff]  }
   0x6   :  { %v2197_v17 = vld [vmem:[%s2646_s2 + $0x48] ss:$12 sps:$4 sm:$0xff]   ;;  %v51_v20 = vld [vmem:[%s2644_s0 + $0x38] sm:$0xff]  ;;  %v53_v21 = vpack.c.bf16 %v47_v16, %v46_v15 }
   0x7   :  { %120 = vmatpush1.bf16.msra.mxu0 %v1937_v4  ;;  %1844 = vmatpush1.bf16.msra.mxu1 %v1937_v4  ;;  %v50_v18 = vld [vmem:[%s2644_s0 + $0x30] sm:$0xff]  ;;  %v2224_v24 = vld [vmem:[%s2646_s2 + $0x38] ss:$12 sps:$4 sm:$0xff]  }
   0x8   :  { %306 = vmatprep.subr.bf16.mxu0 %v2166_v7  ;;  %1765 = vmatprep.subr.bf16.mxu1 %v1944_v14  ;;  %v55_v22 = vpack.c.bf16 %v51_v20, %v50_v18  ;;  %v2229_v25 = vld [vmem:[%s2646_s2 + $0x50] ss:$12 sps:$4 sm:$0xff]  }
   0xa   :  { %1608 = vmatmul.mubr.msk.bf16.vlgmr.msra.gmra.mrb[0].mxu0 %vm104_vm0, %v52_v10  ;;  %1610 = vmatmul.mubr.msk.bf16.vlgmr.msra.gmra.mrb[0].mxu1 %vm104_vm0, %v54_v11 }
   0xb   :  { %307 = vmatpush1.bf16.msra.mxu0 %v2177_v12  ;;  %159 = vmatprep.mubr.bf16.mxu0 %v2099_v2 }
   0xc   :  { %308 = vmatprep.subr.bf16.mxu0 %v2183_v13  ;;  %1766 = vmatpush3.bf16.msra.mxu1 %v1944_v14 }
   0xd   :  { %179 = vmatprep.mubr.bf16.mxu1 %v2099_v2  ;;  %1767 = vmatprep.subr.bf16.mxu1 %v1945_v19 }
   0xf   :  { %309 = vmatpush1.bf16.msra.mxu0 %v2197_v17 }
  0x10   :  { %436 = vmatprep.subr.bf16.mxu0 %v2166_v7  ;;  %1768 = vmatpush3.bf16.msra.mxu1 %v1945_v19 }
  0x11   :  { %1777 = vmatprep.subr.bf16.mxu1 %v2100_v23 }
  0x12   :  { %1609 = vmatmul.mubr.msk.bf16.gmra.mrb[4].mxu0 %vm104_vm0, %v53_v21  ;;  %1611 = vmatmul.mubr.msk.bf16.gmra.mrb[4].mxu1 %vm104_vm0, %v55_v22 }
  0x13   :  { %338 = vmatprep.mubr.bf16.mxu0 %v2099_v2  ;;  %1769 = vmatprep.mubr.msk.bf16.mxu1 %vm104_vm0, %v52_v10 }
  0x1a   :  { %339 = vmatmul.mubr.bf16.vlgmr.msra.gmra.mrb[0].mxu0 %v2099_v2  ;;  %1770 = vmatmul.mubr.msk.bf16.vlgmr.msra.gmra.mrb[8].mxu1 %vm104_vm0, %v53_v21 }
  0x1b   :  { %1778 = vmatpush3.bf16.msra.mxu1 %v2224_v24  ;;  %1773 = vmatprep.mubr.msk.bf16.mxu1 %vm104_vm0, %v54_v11 }
  0x1c   :  { %1779 = vmatprep.subr.bf16.mxu1 %v2100_v23  ;;  %437 = vmatpush1.bf16.msra.mxu0 %v2177_v12 }
  0x1d   :  { %438 = vmatprep.subr.bf16.mxu0 %v2183_v13  ;;  %468 = vmatprep.mubr.bf16.mxu0 %v2099_v2 }
  0x1f   :  { %1780 = vmatpush3.bf16.msra.mxu1 %v2229_v25 }
  0x20   :  { %1785 = vmatprep.subr.bf16.mxu1 %v2100_v23  ;;  %439 = vmatpush1.bf16.msra.mxu0 %v2197_v17 }
  0x21   :  { %566 = vmatprep.subr.bf16.mxu0 %v2166_v7 }
  0x22   :  { %1774 = vmatmul.mubr.msk.bf16.gmra.mrb[12].mxu1 %vm104_vm0, %v55_v22 }
  0x23   :  { %1781 = vmatprep.mubr.msk.bf16.mxu1 %vm2101_vm1, %v2100_v23 }
  0x2a   :  { %1782 = vmatmul.mubr.bf16.vlgmr.msra.gmra.mrb[16].mxu1 %v2099_v2 }
  0x2b   :  { %11 = vsyncpa [#allocation3], 0  ;;  %1786 = vmatpush3.bf16.msra.mxu1 %v2224_v24  ;;  %1789 = vmatprep.mubr.msk.bf16.mxu1 %vm2101_vm1, %v2100_v23  ;;  %v57_v26 = vlaneseq  ;;  %v41_v32 = vld [vmem:[%s2649_s5] ss:$8 sm:$0x7]  ;;  %s2104_s25 = smov 64  }
  0x2c   :  { %1787 = vmatprep.subr.bf16.mxu1 %v2100_v23  ;;  %v1601_v34 = vld [vmem:[%s2649_s5 + $0x1] ss:$8 sm:$0x7]  ;;  %s2105_s28 = smov 96   ;;  %s2106_s29 = smov 32   ;;  %vm1367_vm2 = vcmask 1043456  }
  0x2d   :  { %v2259_v30 = vshrl.u32 %v57_v26, 7  ;;  %vm1007_vm3 = vcmask 523264   ;;  %vm1009_vm4 = vcmask 785408   ;;  %s2107_s16 = smov [#allocation2]  }
  0x2e   :  { %s1593_s17 = sshll.u32 %s2107_s16, 4  ;;  %s1594_s17 = int_to_ptr.vmem [resolvable:$true] %s1593_s17 }
  0x2f   :  { %1788 = vmatpush3.bf16.msra.mxu1 %v2229_v25  ;;  %v59_v33 = vsub.s32 0, %v2259_v30  ;;  %v67_v36 = vsub.s32 2, %v2259_v30  ;;  %v63_v38 = vsub.s32 1, %v2259_v30  ;;  %p2080_p1 = scmp.lt.s32.totalorder %s1594_s17, %s1594_s17 }
  0x30   :  { %1793 = vmatprep.subr.bf16.mxu1 %v2100_v23 }
  0x31   :  { %v2278_v40 = vrot.slane %v41_v32, %v59_v33  ;;  %v2280_v41 = vrot.slane %v1601_v34, %v59_v33  ;;  %v68_v43 = vrot.slane %v41_v32, %v67_v36  ;;  %v2288_v45 = vrot.slane %v41_v32, %v63_v38 }
  0x32   :  { %v2290_v46 = vrot.slane %v1601_v34, %v63_v38  ;;  %v2312_v26 = vrot.slane %v1601_v34, %v67_v36 }
  0x33   :  { %v2286_v44 = vadd.f32 %v2280_v41, %v2278_v40 }
  0x34   :  { %v2294_v48 = vadd.f32 %v2290_v46, %v2288_v45 }
  0xdd   :  { %v2253_v27 = vpop.f32.mrb[0].mxu1 }
  0xde   :  { %v2255_v28 = vpop.f32.mrb[1].mxu1 }
  0xdf   :  { %v2257_v29 = vpop.f32.mrb[2].mxu1 }
  0xe0   :  { %v2261_v31 = vpop.f32.mrb[3].mxu1 }
  0xe5   :  { %v2270_v35 = vpop.f32.mrb[4].mxu1 }
  0xe6   :  { %v2273_v37 = vpop.f32.mrb[5].mxu1 }
  0xe7   :  { %v2276_v39 = vpop.f32.mrb[6].mxu1 }
  0xe8   :  { %v2282_v42 = vpop.f32.mrb[7].mxu1 }
  0xed   :  { %v340_v47 = vpop.f32.mrb[0].mxu0  ;;  %v1771_v49 = vpop.f32.mrb[8].mxu1 }
  0xee   :  { %v1846_v50 = vadd.f32 %v2286_v44, %v340_v47  ;;  %v342_v51 = vpop.f32.mrb[1].mxu0  ;;  %v2297_v52 = vadd.f32 %v1771_v49, %v68_v43  ;;  %v224_v53 = vpop.f32.mrb[9].mxu1 }
  0xef   :  { %v344_v54 = vpop.f32.mrb[2].mxu0  ;;  %v1772_v55 = vpop.f32.mrb[10].mxu1  ;;  %v1848_v61 = vadd.f32 %v2294_v48, %v342_v51  ;;  %v225_v51 = vadd.f32 %v224_v53, %v68_v43 }
  0xf0   :  { %v1622_v56 = vmul.f32 -1.442695, %v1846_v50  ;;  %v1850_v57 = vadd.f32 %v2286_v44, %v344_v54  ;;  %v346_v58 = vpop.f32.mrb[3].mxu0  ;;  %v2300_v59 = vadd.f32 %v1772_v55, %v68_v43  ;;  %v227_v60 = vpop.f32.mrb[11].mxu1 }
  0xf1   :  { %v1852_v63 = vadd.f32 %v2294_v48, %v346_v58  ;;  %v1623_v0 = vmul.f32 -1.442695, %v1848_v61 }
  0xf2   :  { %1995 = vpow2.f32 %v1622_v56  ;;  %v1624_v62 = vmul.f32 -1.442695, %v1850_v57  ;;  %v228_v57 = vadd.f32 %v227_v60, %v68_v43 }
  0xf3   :  { %v1625_v5 = vmul.f32 -1.442695, %v1852_v63 }
  0xf4   :  { %1997 = vpow2.f32 %v1624_v62 }
  0xf5   :  { %v1775_v1 = vpop.f32.mrb[12].mxu1  ;;  %1999 = vpow2.f32 %v1623_v0 }
  0xf6   :  { %v2304_v3 = vadd.f32 %v1775_v1, %v68_v43  ;;  %v240_v4 = vpop.f32.mrb[13].mxu1  ;;  %2001 = vpow2.f32 %v1625_v5 }
  0xf7   :  { %v2306_v6 = vadd.f32 %v240_v4, %v68_v43  ;;  %v1776_v8 = vpop.f32.mrb[14].mxu1 }
  0xf8   :  { %v2308_v9 = vadd.f32 %v1776_v8, %v68_v43  ;;  %v243_v10 = vpop.f32.mrb[15].mxu1 }
  0xf9   :  { %v2310_v11 = vadd.f32 %v243_v10, %v68_v43 }
  0xfc   :  { %v1996_v14 = vpop.eup %1995 }
  0xfd   :  { %v406_v15 = vadd.f32 1.0, %v1996_v14  ;;  %v383_v16 = vpop.f32.mrb[16].mxu1 }
  0xfe   :  { %v1998_v18 = vpop.eup %1997  ;;  %v1783_v19 = vpop.f32.mrb[17].mxu1  ;;  %v384_v47 = vadd.f32 %v383_v16, %v2312_v26 }
  0xff   :  { %2003 = vrcp.f32 %v406_v15  ;;  %v408_v20 = vadd.f32 1.0, %v1998_v18  ;;  %v386_v21 = vpop.f32.mrb[18].mxu1  ;;  %v2000_v32 = vpop.eup %1999 }
 0x100   :  { %v1784_v22 = vpop.f32.mrb[19].mxu1  ;;  %v2002_v33 = vpop.eup %2001  ;;  %v407_v38 = vadd.f32 1.0, %v2000_v32  ;;  %v387_v55 = vadd.f32 %v386_v21, %v2312_v26 }
 0x101   :  { %2005 = vrcp.f32 %v408_v20  ;;  %v409_v49 = vadd.f32 1.0, %v2002_v33 }
 0x102   :  { %2007 = vrcp.f32 %v407_v38 }
 0x103   :  { %2009 = vrcp.f32 %v409_v49 }
 0x109   :  { %v2004_v50 = vpop.eup %2003 }
 0x10a   :  { %v418_v54 = vmul.f32 %v2004_v50, %v384_v47 }
 0x10b   :  { %v2006_v56 = vpop.eup %2005 }
 0x10c   :  { %v420_v58 = vadd.f32 %v418_v54, %v225_v51  ;;  %v419_v61 = vmul.f32 %v2006_v56, %v387_v55  ;;  %v2008_v36 = vpop.eup %2007 }
 0x10d   :  { %v2010_v62 = vpop.eup %2009  ;;  %v424_v63 = vsub.f32 1.0, %v2008_v36  ;;  %v428_v1 = vmul.f32 0.0, %v2008_v36 }
 0x10e   :  { %2011 = vtanh.f32 %v420_v58  ;;  %v421_v34 = vadd.f32 %v419_v61, %v228_v57  ;;  %v425_v4 = vsub.f32 1.0, %v2010_v62  ;;  %v429_v53 = vmul.f32 0.0, %v2010_v62 }
 0x110   :  { %2013 = vtanh.f32 %v421_v34 }
 0x118   :  { %v2012_v0 = vpop.eup %2011 }
 0x119   :  { %v426_v5 = vmul.f32 %v2012_v0, %v424_v63 }
 0x11a   :  { %v2014_v8 = vpop.eup %2013 }
 0x11b   :  { %v2316_v10 = vadd.f32 %v428_v1, %v426_v5  ;;  %v427_v14 = vmul.f32 %v2014_v8, %v425_v4 }
 0x11d   :  { %v2318_v15 = vadd.f32 %v429_v53, %v427_v14 }
 0x11f   :  { %v432_v43 = vpack.c.bf16 %v2318_v15, %v2316_v10 }
 0x121   :  { %1626 = vmatmul.mubr.msk.bf16.vlgmr.msra.gmra.mrb[4].mxu0 %vm104_vm0, %v432_v43  ;;  %1790 = vmatmul.mubr.msk.bf16.vlgmr.msra.gmra.mrb[20].mxu1 %vm104_vm0, %v432_v43 }
 0x122   :  { %567 = vmatpush1.bf16.msra.mxu0 %v2177_v12  ;;  %1794 = vmatpush3.bf16.msra.mxu1 %v2224_v24 }
 0x123   :  { %568 = vmatprep.subr.bf16.mxu0 %v2183_v13  ;;  %1795 = vmatprep.subr.bf16.mxu1 %v2100_v23 }
 0x124   :  { %598 = vmatprep.mubr.bf16.mxu0 %v2099_v2  ;;  %1797 = vmatprep.mubr.msk.bf16.mxu1 %vm2101_vm1, %v2100_v23 }
 0x126   :  { %569 = vmatpush1.bf16.msra.mxu0 %v2197_v17  ;;  %1796 = vmatpush3.bf16.msra.mxu1 %v2229_v25 }
 0x127   :  { %696 = vmatprep.subr.bf16.mxu0 %v2166_v7  ;;  %1801 = vmatprep.subr.bf16.mxu1 %v2100_v23 }
 0x1f4   :  { %v470_v60 = vpop.f32.mrb[4].mxu0  ;;  %v513_v16 = vpop.f32.mrb[20].mxu1 }
 0x1f5   :  { %v1854_v18 = vadd.f32 %v2286_v44, %v470_v60  ;;  %v472_v19 = vpop.f32.mrb[5].mxu0  ;;  %v1791_v20 = vpop.f32.mrb[21].mxu1  ;;  %v514_v36 = vadd.f32 %v513_v16, %v2312_v26 }
 0x1f6   :  { %v474_v21 = vpop.f32.mrb[6].mxu0  ;;  %v516_v22 = vpop.f32.mrb[22].mxu1  ;;  %v1856_v49 = vadd.f32 %v2294_v48, %v472_v19 }
 0x1f7   :  { %v1628_v32 = vmul.f32 -1.442695, %v1854_v18  ;;  %v1858_v33 = vadd.f32 %v2286_v44, %v474_v21  ;;  %v476_v38 = vpop.f32.mrb[7].mxu0  ;;  %v1792_v47 = vpop.f32.mrb[23].mxu1 }
 0x1f8   :  { %v1860_v7 = vadd.f32 %v2294_v48, %v476_v38  ;;  %v1629_v51 = vmul.f32 -1.442695, %v1856_v49  ;;  %v517_v48 = vadd.f32 %v516_v22, %v2312_v26 }
 0x1f9   :  { %2015 = vpow2.f32 %v1628_v32  ;;  %v1630_v50 = vmul.f32 -1.442695, %v1858_v33  ;;  %v172_v33 = vadd.f32 %v2253_v27, %v2278_v40 }
 0x1fa   :  { %v1631_v54 = vmul.f32 -1.442695, %v1860_v7 }
 0x1fb   :  { %2017 = vpow2.f32 %v1630_v50 }
 0x1fc   :  { %2019 = vpow2.f32 %v1629_v51 }
 0x1fd   :  { %2021 = vpow2.f32 %v1631_v54 }
 0x203   :  { %v2016_v55 = vpop.eup %2015 }
 0x204   :  { %v536_v56 = vadd.f32 1.0, %v2016_v55 }
 0x205   :  { %v2018_v57 = vpop.eup %2017 }
 0x206   :  { %2023 = vrcp.f32 %v536_v56  ;;  %v538_v58 = vadd.f32 1.0, %v2018_v57  ;;  %v2020_v44 = vpop.eup %2019 }
 0x207   :  { %v2022_v61 = vpop.eup %2021  ;;  %v537_v34 = vadd.f32 1.0, %v2020_v44 }
 0x208   :  { %2025 = vrcp.f32 %v538_v58  ;;  %v539_v62 = vadd.f32 1.0, %v2022_v61 }
 0x209   :  { %2027 = vrcp.f32 %v537_v34 }
 0x20a   :  { %2029 = vrcp.f32 %v539_v62 }
 0x210   :  { %v2024_v63 = vpop.eup %2023 }
 0x211   :  { %v548_v0 = vmul.f32 %v2024_v63, %v514_v36 }
 0x212   :  { %v2026_v1 = vpop.eup %2025 }
 0x213   :  { %v550_v4 = vadd.f32 %v548_v0, %v2297_v52  ;;  %v549_v5 = vmul.f32 %v2026_v1, %v517_v48  ;;  %v2028_v53 = vpop.eup %2027 }
 0x214   :  { %v2030_v14 = vpop.eup %2029  ;;  %v554_v43 = vsub.f32 1.0, %v2028_v53  ;;  %v558_v18 = vmul.f32 %v2028_v53, %v2316_v10 }
 0x215   :  { %2031 = vtanh.f32 %v550_v4  ;;  %v551_v8 = vadd.f32 %v549_v5, %v2300_v59  ;;  %v555_v19 = vsub.f32 1.0, %v2030_v14  ;;  %v559_v52 = vmul.f32 %v2030_v14, %v2318_v15 }
 0x217   :  { %2033 = vtanh.f32 %v551_v8 }
 0x21f   :  { %v2032_v60 = vpop.eup %2031 }
 0x220   :  { %v556_v16 = vmul.f32 %v2032_v60, %v554_v43 }
 0x221   :  { %v2034_v20 = vpop.eup %2033 }
 0x222   :  { %v2344_v21 = vadd.f32 %v558_v18, %v556_v16  ;;  %v557_v22 = vmul.f32 %v2034_v20, %v555_v19 }
 0x224   :  { %v2347_v32 = vadd.f32 %v559_v52, %v557_v22 }
 0x226   :  { %v562_v59 = vpack.c.bf16 %v2347_v32, %v2344_v21 }
 0x228   :  { %1632 = vmatmul.mubr.msk.bf16.vlgmr.msra.gmra.mrb[8].mxu0 %vm104_vm0, %v562_v59  ;;  %1798 = vmatmul.mubr.msk.bf16.vlgmr.msra.gmra.mrb[24].mxu1 %vm104_vm0, %v562_v59 }
 0x229   :  { %697 = vmatpush1.bf16.msra.mxu0 %v2177_v12  ;;  %1802 = vmatpush3.bf16.msra.mxu1 %v2224_v24  ;;  %v174_v12 = vadd.f32 %v2255_v28, %v2288_v45  ;;  %v178_v24 = vadd.f32 %v2261_v31, %v2288_v45 }
 0x22a   :  { %698 = vmatprep.subr.bf16.mxu0 %v2183_v13  ;;  %1803 = vmatprep.subr.bf16.mxu1 %v2100_v23  ;;  %v176_v13 = vadd.f32 %v2257_v29, %v2278_v40 }
 0x22b   :  { %728 = vmatprep.mubr.bf16.mxu0 %v2099_v2  ;;  %1805 = vmatprep.mubr.msk.bf16.mxu1 %vm2101_vm1, %v2100_v23  ;;  %v1862_v2 = vadd.f32 %v2280_v41, %v172_v33  ;;  %v1871_v54 = vadd.f32 %v2290_v46, %v178_v24 }
 0x22c   :  { %v1868_v27 = vadd.f32 %v2280_v41, %v176_v13 }
 0x22d   :  { %699 = vmatpush1.bf16.msra.mxu0 %v2197_v17  ;;  %1804 = vmatpush3.bf16.msra.mxu1 %v2229_v25  ;;  %v1865_v17 = vadd.f32 %v2290_v46, %v174_v12 }
 0x2fb   :  { %v600_v38 = vpop.f32.mrb[8].mxu0  ;;  %v643_v47 = vpop.f32.mrb[24].mxu1 }
 0x2fc   :  { %v1863_v49 = vadd.f32 %v1862_v2, %v600_v38  ;;  %v602_v25 = vpop.f32.mrb[9].mxu0  ;;  %v1799_v50 = vpop.f32.mrb[25].mxu1  ;;  %v644_v4 = vadd.f32 %v643_v47, %v2312_v26  ;;  %v1948_v47 = vld [vmem:[%s2647_s3 + $0x40] sm:$0xff]  }
 0x2fd   :  { %v1866_v7 = vadd.f32 %v1865_v17, %v602_v25  ;;  %v604_v51 = vpop.f32.mrb[10].mxu0  ;;  %v646_v28 = vpop.f32.mrb[26].mxu1  ;;  %v1949_v17 = vld [vmem:[%s2647_s3] sm:$0xff]   ;;  %1707 = vmatprep.subr.bf16.mxu1 %v1948_v47 }
 0x2fe   :  { %v1634_v29 = vmul.f32 -1.442695, %v1863_v49  ;;  %v1869_v55 = vadd.f32 %v1868_v27, %v604_v51  ;;  %v606_v56 = vpop.f32.mrb[11].mxu0  ;;  %v1800_v31 = vpop.f32.mrb[27].mxu1  ;;  %v647_v14 = vadd.f32 %v646_v28, %v2312_v26  ;;  %v1950_v49 = vld [vmem:[%s2647_s3 + $0x48] sm:$0xff]   ;;  %v1951_v25 = vld [vmem:[%s2647_s3 + $0xc0] sm:$0xff]  }
 0x2ff   :  { %v1872_v57 = vadd.f32 %v1871_v54, %v606_v56  ;;  %v1635_v44 = vmul.f32 -1.442695, %v1866_v7  ;;  %v1953_v50 = vld [vmem:[%s2647_s3 + $0x80] sm:$0xff]   ;;  %v1955_v27 = vld [vmem:[%s2647_s3 + $0xc8] sm:$0xff]   ;;  %1729 = vmatprep.subr.bf16.mxu0 %v1951_v25  ;;  %v1954_v51 = vld [vmem:[%s2647_s3 + $0x50] sm:$0xff]  }
 0x300   :  { %2035 = vpow2.f32 %v1634_v29  ;;  %v1636_v58 = vmul.f32 -1.442695, %v1869_v55  ;;  %v1952_v7 = vld [vmem:[%s2647_s3 + $0x8] sm:$0xff]   ;;  %v1959_v54 = vld [vmem:[%s2647_s3 + $0xd0] sm:$0xff]   ;;  %v1958_v55 = vld [vmem:[%s2647_s3 + $0x58] sm:$0xff]  }
 0x301   :  { %v1637_v61 = vmul.f32 -1.442695, %v1872_v57  ;;  %v1957_v28 = vld [vmem:[%s2647_s3 + $0x88] sm:$0xff]   ;;  %v1956_v29 = vld [vmem:[%s2647_s3 + $0x10] sm:$0xff]   ;;  %v1963_v31 = vld [vmem:[%s2647_s3 + $0xd8] sm:$0xff]  }
 0x302   :  { %2037 = vpow2.f32 %v1636_v58  ;;  %v1961_v56 = vld [vmem:[%s2647_s3 + $0x90] sm:$0xff]   ;;  %v1960_v57 = vld [vmem:[%s2647_s3 + $0x18] sm:$0xff]   ;;  %v1962_v58 = vld [vmem:[%s2647_s3 + $0x60] sm:$0xff]  }
 0x303   :  { %2039 = vpow2.f32 %v1635_v44  ;;  %v1965_v44 = vld [vmem:[%s2647_s3 + $0x98] sm:$0xff]  }
 0x304   :  { %2041 = vpow2.f32 %v1637_v61  ;;  %v1964_v61 = vld [vmem:[%s2647_s3 + $0x20] sm:$0xff]  }
 0x30a   :  { %v2036_v34 = vpop.eup %2035 }
 0x30b   :  { %v666_v36 = vadd.f32 1.0, %v2036_v34  ;;  %v182_v34 = vadd.f32 %v2270_v35, %v2278_v40 }
 0x30c   :  { %v2038_v62 = vpop.eup %2037 }
 0x30d   :  { %2043 = vrcp.f32 %v666_v36  ;;  %v668_v63 = vadd.f32 1.0, %v2038_v62  ;;  %v2040_v0 = vpop.eup %2039  ;;  %v184_v36 = vadd.f32 %v2273_v37, %v2288_v45  ;;  %v186_v62 = vadd.f32 %v2276_v39, %v2278_v40 }
 0x30e   :  { %v2042_v48 = vpop.eup %2041  ;;  %v667_v1 = vadd.f32 1.0, %v2040_v0  ;;  %v1874_v0 = vadd.f32 %v2280_v41, %v182_v34 }
 0x30f   :  { %2045 = vrcp.f32 %v668_v63  ;;  %v669_v5 = vadd.f32 1.0, %v2042_v48  ;;  %v188_v63 = vadd.f32 %v2282_v42, %v2288_v45  ;;  %v1880_v35 = vadd.f32 %v2280_v41, %v186_v62  ;;  %v1967_v62 = vld [vmem:[%s2647_s3 + $0xe0] sm:$0xff]  }
 0x310   :  { %2047 = vrcp.f32 %v667_v1 }
 0x311   :  { %2049 = vrcp.f32 %v669_v5 }
 0x317   :  { %v2044_v8 = vpop.eup %2043 }
 0x318   :  { %v678_v53 = vmul.f32 %v2044_v8, %v644_v4  ;;  %v1877_v4 = vadd.f32 %v2290_v46, %v184_v36  ;;  %v1966_v36 = vld [vmem:[%s2647_s3 + $0x68] sm:$0xff]  }
 0x319   :  { %v2046_v43 = vpop.eup %2045 }
 0x31a   :  { %v680_v60 = vadd.f32 %v678_v53, %v2306_v6  ;;  %v679_v16 = vmul.f32 %v2046_v43, %v647_v14  ;;  %v2048_v19 = vpop.eup %2047 }
 0x31b   :  { %v2050_v20 = vpop.eup %2049  ;;  %v684_v22 = vsub.f32 1.0, %v2048_v19  ;;  %v688_v33 = vmul.f32 %v2048_v19, %v2344_v21 }
 0x31c   :  { %2051 = vtanh.f32 %v680_v60  ;;  %v681_v18 = vadd.f32 %v679_v16, %v2310_v11  ;;  %v685_v12 = vsub.f32 1.0, %v2050_v20  ;;  %v689_v6 = vmul.f32 %v2050_v20, %v2347_v32 }
 0x31d   :  { %v1883_v60 = vadd.f32 %v2290_v46, %v188_v63  ;;  %v1968_v63 = vld [vmem:[%s2647_s3 + $0x28] sm:$0xff]  }
 0x31e   :  { %2053 = vtanh.f32 %v681_v18 }
 0x326   :  { %v2052_v52 = vpop.eup %2051 }
 0x327   :  { %v686_v59 = vmul.f32 %v2052_v52, %v684_v22 }
 0x328   :  { %v2054_v13 = vpop.eup %2053 }
 0x329   :  { %v2379_v24 = vadd.f32 %v688_v33, %v686_v59  ;;  %v687_v2 = vmul.f32 %v2054_v13, %v685_v12 }
 0x32b   :  { %v2382_v38 = vadd.f32 %v689_v6, %v687_v2 }
 0x32d   :  { %v692_v11 = vpack.c.bf16 %v2382_v38, %v2379_v24 }
 0x32f   :  { %1638 = vmatmul.mubr.msk.bf16.vlgmr.msra.gmra.mrb[12].mxu0 %vm104_vm0, %v692_v11  ;;  %1806 = vmatmul.mubr.msk.bf16.vlgmr.msra.gmra.mrb[28].mxu1 %vm104_vm0, %v692_v11 }
 0x330   :  { %1708 = vmatpush3.bf16.msra.mxu1 %v1949_v17  ;;  %1730 = vmatpush3.bf16.msra.mxu0 %v1953_v50 }
 0x331   :  { %1709 = vmatprep.subr.bf16.mxu1 %v1950_v49  ;;  %1731 = vmatprep.subr.bf16.mxu0 %v1955_v27  ;;  %v2102_v27 = vmov 1983009808  }
 0x334   :  { %1710 = vmatpush3.bf16.msra.mxu1 %v1952_v7  ;;  %1732 = vmatpush3.bf16.msra.mxu0 %v1957_v28  ;;  %v825_v7 = vunpack.c.l.s4 %v2102_v27 }
 0x335   :  { %1711 = vmatprep.subr.bf16.mxu1 %v1954_v51  ;;  %1733 = vmatprep.subr.bf16.mxu0 %v1959_v54 }
 0x336   :  { %v826_v28 = vunpack.c.0.s8 %v825_v7 }
 0x338   :  { %1712 = vmatpush3.bf16.msra.mxu1 %v1956_v29  ;;  %1734 = vmatpush3.bf16.msra.mxu0 %v1961_v56  ;;  %v2103_v29 = vmov 1934713408  }
 0x339   :  { %1713 = vmatprep.subr.bf16.mxu1 %v1958_v55  ;;  %1735 = vmatprep.subr.bf16.mxu0 %v1963_v31  ;;  %v857_v55 = vunpack.c.l.s4 %v2103_v29 }
 0x33b   :  { %v858_v34 = vunpack.c.0.s8 %v857_v55 }
 0x33c   :  { %1714 = vmatpush3.bf16.msra.mxu1 %v1960_v57  ;;  %1736 = vmatpush3.bf16.msra.mxu0 %v1965_v44 }
 0x33d   :  { %1715 = vmatprep.subr.bf16.mxu1 %v1962_v58  ;;  %1737 = vmatprep.subr.bf16.mxu0 %v1967_v62 }
 0x340   :  { %1716 = vmatpush3.bf16.msra.mxu1 %v1964_v61  ;;  %v823_v61 = vcombine.high %v2316_v10, %v2379_v24 }
 0x341   :  { %1717 = vmatprep.subr.bf16.mxu1 %v1966_v36  ;;  %v1361_v36 = vld [vmem:[%s2645_s1] sm:$0xff] }
 0x342   :  { %v1365_v62 = vcombine.high %v1361_v36, %v1361_v36 }
 0x344   :  { %1718 = vmatpush3.bf16.msra.mxu1 %v1968_v63  ;;  %v1363_v63 = vld [vmem:[%s2645_s1 + $0x10] sm:$0xff] }
 0x402   :  { %v730_v48 = vpop.f32.mrb[12].mxu0  ;;  %v773_v1 = vpop.f32.mrb[28].mxu1 }
 0x403   :  { %v1875_v5 = vadd.f32 %v1874_v0, %v730_v48  ;;  %v732_v8 = vpop.f32.mrb[13].mxu0  ;;  %v1807_v53 = vpop.f32.mrb[29].mxu1  ;;  %v774_v13 = vadd.f32 %v773_v1, %v2312_v26 }
 0x404   :  { %v1878_v14 = vadd.f32 %v1877_v4, %v732_v8  ;;  %v734_v43 = vpop.f32.mrb[14].mxu0  ;;  %v776_v37 = vpop.f32.mrb[30].mxu1 }
 0x405   :  { %v1640_v39 = vmul.f32 -1.442695, %v1875_v5  ;;  %v1881_v40 = vadd.f32 %v1880_v35, %v734_v43  ;;  %v736_v16 = vpop.f32.mrb[15].mxu0  ;;  %v1808_v42 = vpop.f32.mrb[31].mxu1  ;;  %v777_v47 = vadd.f32 %v776_v37, %v2312_v26  ;;  %v822_v26 = vcombine.low %v2316_v10, %v2379_v24  ;;  %v1969_v10 = vld [vmem:[%s2647_s3 + $0xa0] sm:$0xff]   ;;  %v1970_v37 = vld [vmem:[%s2647_s3 + $0x70] sm:$0xff]  }
 0x406   :  { %v1884_v45 = vadd.f32 %v1883_v60, %v736_v16  ;;  %v1641_v19 = vmul.f32 -1.442695, %v1878_v14  ;;  %1738 = vmatpush3.bf16.msra.mxu0 %v1969_v10  ;;  %v861_v35 = vsub.s32 %v858_v34, %v2259_v30  ;;  %v890_v14 = vcombine.low %v2318_v15, %v2382_v38  ;;  %v1972_v16 = vld [vmem:[%s2647_s3 + $0x30] sm:$0xff]   ;;  %1719 = vmatprep.subr.bf16.mxu1 %v1970_v37 }
 0x407   :  { %2055 = vpow2.f32 %v1640_v39  ;;  %v1642_v18 = vmul.f32 -1.442695, %v1881_v40  ;;  %v891_v43 = vcombine.high %v2318_v15, %v2382_v38  ;;  %v1973_v15 = vld [vmem:[%s2647_s3 + $0xa8] sm:$0xff]   ;;  %1720 = vmatpush3.bf16.msra.mxu1 %v1972_v16  ;;  %v1390_v10 = vcombine.high %v1363_v63, %v1363_v63 }
 0x408   :  { %v1643_v20 = vmul.f32 -1.442695, %v1884_v45 }
 0x409   :  { %2057 = vpow2.f32 %v1642_v18 }
 0x40a   :  { %2059 = vpow2.f32 %v1641_v19 }
 0x40b   :  { %2061 = vpow2.f32 %v1643_v20 }
 0x411   :  { %v2056_v22 = vpop.eup %2055 }
 0x412   :  { %v796_v52 = vadd.f32 1.0, %v2056_v22 }
 0x413   :  { %v2058_v41 = vpop.eup %2057 }
 0x414   :  { %2063 = vrcp.f32 %v796_v52  ;;  %v798_v59 = vadd.f32 1.0, %v2058_v41  ;;  %v2060_v33 = vpop.eup %2059  ;;  %v1975_v41 = vld [vmem:[%s2647_s3 + $0xf0] sm:$0xff]  }
 0x415   :  { %v2062_v46 = vpop.eup %2061  ;;  %v797_v12 = vadd.f32 1.0, %v2060_v33 }
 0x416   :  { %2065 = vrcp.f32 %v798_v59  ;;  %v799_v2 = vadd.f32 1.0, %v2062_v46 }
 0x417   :  { %2067 = vrcp.f32 %v797_v12 }
 0x418   :  { %2069 = vrcp.f32 %v799_v2  ;;  %v1977_v2 = vld [vmem:[%s2647_s3 + $0xb0] sm:$0xff]  }
 0x41e   :  { %v2064_v6 = vpop.eup %2063 }
 0x41f   :  { %v808_v11 = vmul.f32 %v2064_v6, %v774_v13  ;;  %v1976_v13 = vld [vmem:[%s2647_s3 + $0x38] sm:$0xff]  }
 0x420   :  { %v2066_v17 = vpop.eup %2065 }
 0x421   :  { %v810_v49 = vadd.f32 %v808_v11, %v2304_v3  ;;  %v809_v25 = vmul.f32 %v2066_v17, %v777_v47  ;;  %v2068_v51 = vpop.eup %2067  ;;  %v829_v3 = vsub.s32 %v826_v28, %v2259_v30 }
 0x422   :  { %v2070_v54 = vpop.eup %2069  ;;  %v814_v56 = vsub.f32 1.0, %v2068_v51  ;;  %v818_v44 = vmul.f32 %v2068_v51, %v2379_v24 }
 0x423   :  { %2071 = vtanh.f32 %v810_v49  ;;  %v811_v50 = vadd.f32 %v809_v25, %v2308_v9  ;;  %v815_v57 = vsub.f32 1.0, %v2070_v54  ;;  %v819_v48 = vmul.f32 %v2070_v54, %v2382_v38  ;;  %v1978_v54 = vld [vmem:[%s2647_s3 + $0xf8] sm:$0xff]  }
 0x424   :  { %v830_v24 = vrot.slane %v822_v26, %v829_v3  ;;  %v837_v53 = vrot.slane %v823_v61, %v829_v3  ;;  %v898_v19 = vrot.slane %v890_v14, %v829_v3  ;;  %v905_v20 = vrot.slane %v891_v43, %v829_v3 }
 0x425   :  { %2073 = vtanh.f32 %v811_v50 }
 0x42d   :  { %v2072_v31 = vpop.eup %2071 }
 0x42e   :  { %v816_v58 = vmul.f32 %v2072_v31, %v814_v56  ;;  %v1979_v31 = vld [vmem:[%s2647_s3 + $0xb8] sm:$0xff]  }
 0x42f   :  { %v2074_v9 = vpop.eup %2073 }
 0x430   :  { %v817_v0 = vmul.f32 %v2074_v9, %v815_v57  ;;  %v820_v1 = vadd.f32 %v818_v44, %v816_v58 }
 0x432   :  { %v838_v4 = vcombine.low %v2344_v21, %v820_v1  ;;  %v839_v5 = vcombine.high %v2344_v21, %v820_v1  ;;  %v821_v8 = vadd.f32 %v819_v48, %v817_v0  ;;  %v1971_v21 = vld [vmem:[%s2647_s3 + $0xe8] sm:$0xff]   ;;  %v1368_v0 = vsel %vm1367_vm2, %v1361_v36, 0.0  ;;  %v1088_v36 = vld [vmem:[%s2649_s5 + $0x2] ss:$0 sm:$0xff] }
 0x433   :  { %1739 = vmatprep.subr.bf16.mxu0 %v1971_v21  ;;  %v1369_v48 = vsel %vm1367_vm2, %v1365_v62, 0.0  ;;  %v1362_v1 = vld [vmem:[%s2645_s1 + $0x8] sm:$0xff] }
 0x434   :  { %v846_v60 = vrot.slane %v838_v4, %v829_v3  ;;  %v853_v39 = vrot.slane %v839_v5, %v829_v3  ;;  %v906_v40 = vcombine.low %v2347_v32, %v821_v8  ;;  %v907_v30 = vcombine.high %v2347_v32, %v821_v8  ;;  %1740 = vmatpush3.bf16.msra.mxu0 %v1973_v15  ;;  %v1974_v32 = vld [vmem:[%s2647_s3 + $0x78] sm:$0xff]  }
 0x435   :  { %1721 = vmatprep.subr.bf16.mxu1 %v1974_v32  ;;  %1741 = vmatprep.subr.bf16.mxu0 %v1975_v41  ;;  %v1378_v4 = vcombine.high %v1362_v1, %v1362_v1  ;;  %v1392_v5 = vsel %vm1367_vm2, %v1363_v63, 0.0  ;;  %v1393_v8 = vsel %vm1367_vm2, %v1390_v10, 0.0  ;;  %v1374_v63 = vld [vmem:[%s2649_s5 + $0x5] ss:$0 sm:$0xff] }
 0x436   :  { %v855_v38 = vcombine.high %v830_v24, %v846_v60  ;;  %v870_v42 = vcombine.low %v837_v53, %v853_v39  ;;  %v871_v45 = vcombine.high %v837_v53, %v853_v39  ;;  %v854_v18 = vcombine.low %v830_v24, %v846_v60  ;;  %1722 = vmatpush3.bf16.msra.mxu1 %v1976_v13 }
 0x437   :  { %v914_v22 = vrot.slane %v906_v40, %v829_v3  ;;  %v921_v52 = vrot.slane %v907_v30, %v829_v3  ;;  %1809 = vmatprep.subr.bf16.mxu1 %v2100_v23  ;;  %v1370_v24 = vadd.f32 %v1369_v48, %v1368_v0  ;;  %v1380_v53 = vsel %vm1367_vm2, %v1362_v1, 0.0 }
 0x438   :  { %v869_v59 = vrot.slane %v855_v38, %v861_v35  ;;  %v885_v33 = vrot.slane %v871_v45, %v861_v35  ;;  %v2504_v46 = vrot.slane %v854_v18, %v861_v35  ;;  %v2506_v12 = vrot.slane %v870_v42, %v861_v35  ;;  %1742 = vmatpush3.bf16.msra.mxu0 %v1977_v2 }
 0x439   :  { %v922_v6 = vcombine.low %v898_v19, %v914_v22  ;;  %v938_v11 = vcombine.low %v905_v20, %v921_v52  ;;  %v923_v47 = vcombine.high %v898_v19, %v914_v22  ;;  %v939_v17 = vcombine.high %v905_v20, %v921_v52  ;;  %1743 = vmatprep.subr.bf16.mxu0 %v1978_v54  ;;  %v1984_v54 = vld [vmem:[%s2648_s4 + $0x8] sm:$0xff]  }
 0x43a   :  { %v1902_v49 = vpack.i.bf16 %v869_v59, %v885_v33  ;;  %v887_v25 = vcombine.high %v869_v59, %v2100_v23  ;;  %v889_v50 = vcombine.high %v885_v33, %v2100_v23  ;;  %v886_v27 = vcombine.high %v2504_v46, %v2100_v23 }
 0x43b   :  { %v888_v7 = vcombine.high %v2506_v12, %v2100_v23  ;;  %v2520_v51 = vrot.slane %v922_v6, %v861_v35  ;;  %v2522_v28 = vrot.slane %v938_v11, %v861_v35  ;;  %v937_v55 = vrot.slane %v923_v47, %v861_v35 }
 0x43c   :  { %1903 = vrot.lane.b32.xlu0 %v1902_v49, %s2104_s25  ;;  %v1912_v29 = vpack.i.bf16 %v887_v25, %v889_v50  ;;  %v953_v56 = vrot.slane %v939_v17, %v861_v35  ;;  %1744 = vmatpush3.bf16.msra.mxu0 %v1979_v31  ;;  %v1381_v35 = vsel %vm1367_vm2, %v1378_v4, 0.0  ;;  %v1394_v14 = vadd.f32 %v1393_v8, %v1392_v5  ;;  %v1988_v31 = vld [vmem:[%s2648_s4 + $0x28] sm:$0xff]   ;;  %v1386_v8 = vld [vmem:[%s2649_s5 + $0x6] ss:$0 sm:$0xff] }
 0x43d   :  { %v954_v26 = vcombine.high %v2520_v51, %v2100_v23  ;;  %v956_v3 = vcombine.high %v2522_v28, %v2100_v23  ;;  %v1907_v57 = vpack.i.bf16 %v886_v27, %v888_v7  ;;  %v955_v44 = vcombine.high %v937_v55, %v2100_v23  ;;  %1821 = vmatprep.subr.bf16.mxu0 %v2100_v23 }
 0x43e   :  { %1913 = vrot.lane.b32.xlu1 %v1912_v29, %s2105_s28  ;;  %v957_v9 = vcombine.high %v953_v56, %v2100_v23  ;;  %v1917_v61 = vpack.i.bf16 %v937_v55, %v953_v56  ;;  %v1382_v43 = vadd.f32 %v1381_v35, %v1380_v53  ;;  %v1985_v29 = vld [vmem:[%s2648_s4 + $0x10] sm:$0xff]   ;;  %v1986_v55 = vld [vmem:[%s2648_s4 + $0x18] sm:$0xff]   ;;  %v1987_v56 = vld [vmem:[%s2648_s4 + $0x20] sm:$0xff]  }
 0x43f   :  { %v1922_v58 = vpack.i.bf16 %v954_v26, %v956_v3  ;;  %v1989_v26 = vld [vmem:[%s2648_s4 + $0x30] sm:$0xff]   ;;  %v1990_v3 = vld [vmem:[%s2648_s4 + $0x38] sm:$0xff]  }
 0x440   :  { %1908 = vrot.lane.b32.xlu0 %v1907_v57, %s2106_s29  ;;  %v1927_v34 = vpack.i.bf16 %v955_v44, %v957_v9  ;;  %v1991_v57 = vld [vmem:[%s2648_s4 + $0x40] sm:$0xff]  }
 0x442   :  { %1923 = vrot.lane.b32.xlu1 %v1922_v58, %s2106_s29  ;;  %v1992_v58 = vld [vmem:[%s2648_s4 + $0x48] sm:$0xff]  }
 0x444   :  { %1918 = vrot.lane.b32.xlu0 %v1917_v61, %s2104_s25 }
 0x446   :  { %1928 = vrot.lane.b32.xlu1 %v1927_v34, %s2105_s28 }
 0x463   :  { %1371 = vadd.xlane.f32.xlu0 %v1370_v24 }
 0x467   :  { %1395 = vadd.xlane.f32.xlu0 %v1394_v14 }
 0x46a   :  { %1383 = vadd.xlane.f32.xlu1 %v1382_v43 }
 0x4ae   :  { %v1904_v37 = vpop.permute.xlu0 %1903 }
 0x4af   :  { %v1906_v30 = vunpack.i.h.bf16 %v1904_v37  ;;  %v1905_v16 = vunpack.i.l.bf16 %v1904_v37 }
 0x4b0   :  { %v1914_v21 = vpop.permute.xlu1 %1913 }
 0x4b1   :  { %v1916_v19 = vunpack.i.h.bf16 %v1914_v21  ;;  %v1915_v20 = vunpack.i.l.bf16 %v1914_v21 }
 0x4b2   :  { %v1909_v60 = vpop.permute.xlu0 %1908 }
 0x4b3   :  { %v1911_v39 = vunpack.i.h.bf16 %v1909_v60  ;;  %v1910_v40 = vunpack.i.l.bf16 %v1909_v60  ;;  %v1398_v60 = vld [vmem:[%s2649_s5 + $0x7] ss:$0 sm:$0xff] }
 0x4b4   :  { %v1924_v15 = vpop.permute.xlu1 %1923 }
 0x4b5   :  { %v1006_v38 = vsel %vm104_vm0, %v2504_v46, %v1911_v39  ;;  %v1011_v42 = vsel %vm104_vm0, %v2506_v12, %v1910_v40  ;;  %v1926_v45 = vunpack.i.h.bf16 %v1924_v15  ;;  %v1925_v18 = vunpack.i.l.bf16 %v1924_v15 }
 0x4b6   :  { %v1008_v22 = vsel %vm1007_vm3, %v1006_v38, %v1906_v30  ;;  %v1919_v52 = vpop.permute.xlu0 %1918  ;;  %v1012_v32 = vsel %vm1007_vm3, %v1011_v42, %v1905_v16 }
 0x4b7   :  { %v1014_v41 = vsel %vm104_vm0, %v2520_v51, %v1926_v45  ;;  %v1017_v59 = vsel %vm104_vm0, %v2522_v28, %v1925_v18  ;;  %v1921_v33 = vunpack.i.h.bf16 %v1919_v52  ;;  %v1920_v46 = vunpack.i.l.bf16 %v1919_v52  ;;  %v1983_v28 = vld [vmem:[%s2648_s4] sm:$0xff]   ;;  %v1993_v18 = vld [vmem:[%s2648_s4 + $0x50] sm:$0xff]  }
 0x4b8   :  { %v1929_v13 = vpop.permute.xlu1 %1928  ;;  %v1013_v12 = vsel %vm1009_vm4, %v1012_v32, %v1915_v20  ;;  %v1010_v2 = vsel %vm1009_vm4, %v1008_v22, %v1916_v19  ;;  %v1994_v19 = vld [vmem:[%s2648_s4 + $0x58] sm:$0xff]   ;;  %v1411_v20 = vld [vmem:[%s2649_s5 + $0x3] ss:$0 sm:$0xff]  ;;  %s2075_s4 = scalar_lea.vmem %s1594_s17, 64 }
 0x4b9   :  { %v1015_v6 = vsel %vm1007_vm3, %v1014_v41, %v1921_v33  ;;  %v1018_v11 = vsel %vm1007_vm3, %v1017_v59, %v1920_v46  ;;  %v1931_v47 = vunpack.i.h.bf16 %v1929_v13  ;;  %v1930_v17 = vunpack.i.l.bf16 %v1929_v13  ;;  %p2076_p0 = scmp.ne.s32.totalorder %s1594_s17, %s2075_s4  ;;  %p2081_p2 = scmp.lt.s32.totalorder %s2075_s4, %s2075_s4 }
 0x4ba   :  { %v1021_v49 = vpack.c.bf16 %v1013_v12, %v1013_v12  ;;  %v1020_v25 = vpack.c.bf16 %v1010_v2, %v1010_v2 }
 0x4bb   :  { %v1016_v50 = vsel %vm1009_vm4, %v1015_v6, %v1931_v47  ;;  %v1019_v27 = vsel %vm1009_vm4, %v1018_v11, %v1930_v17  ;;  %p2082_p3 = por %p2081_p2, %p2080_p1 }
 0x4bc   :  { %v1022_v7 = vpack.c.bf16 %v1016_v50, %v1016_v50  ;;  %1313 = vmatprep.mubr.bf16.mxu1 %v1021_v49  ;;  %v1023_v51 = vpack.c.bf16 %v1019_v27, %v1019_v27 }
 0x4bd   :  { %1314 = vmatmul.mubr.bf16.vlgmr.msra.gmra.mrb[32].mxu1 %v1020_v25  ;;  %p2083_p4 = pnand %p2082_p3, %p2076_p0 }
 0x4be   :  { %1353 = vmatprep.mubr.bf16.mxu0 %v1023_v51  ;;  %1817 = vmatprep.mubr.msk.bf16.mxu1 %vm2101_vm1, %v2100_v23 }
 0x4bf   :  { %1354 = vmatmul.mubr.bf16.vlgmr.msra.gmra.mrb[16].mxu0 %v1022_v7  ;;  %1810 = vmatpush3.bf16.msra.mxu1 %v1983_v28 }
 0x4c0   :  { %1837 = vmatprep.mubr.msk.bf16.mxu0 %vm2101_vm1, %v2100_v23  ;;  %1811 = vmatprep.subr.bf16.mxu1 %v2100_v23 }
 0x4c1   :  { %1822 = vmatpush3.bf16.msra.mxu0 %v1987_v56 }
 0x4c2   :  { %1823 = vmatprep.subr.bf16.mxu0 %v2100_v23 }
 0x4c3   :  { %1812 = vmatpush3.bf16.msra.mxu1 %v1984_v54 }
 0x4c4   :  { %1813 = vmatprep.subr.bf16.mxu1 %v2100_v23 }
 0x4c5   :  { %1824 = vmatpush3.bf16.msra.mxu0 %v1988_v31 }
 0x4c6   :  { %1825 = vmatprep.subr.bf16.mxu0 %v2100_v23 }
 0x4c7   :  { %1814 = vmatpush3.bf16.msra.mxu1 %v1985_v29 }
 0x4c8   :  { %1815 = vmatprep.subr.bf16.mxu1 %v2100_v23 }
 0x4c9   :  { %1826 = vmatpush3.bf16.msra.mxu0 %v1989_v26 }
 0x4ca   :  { %1827 = vmatprep.subr.bf16.mxu0 %v2100_v23 }
 0x4cb   :  { %1816 = vmatpush3.bf16.msra.mxu1 %v1986_v55 }
 0x4cd   :  { %1828 = vmatpush3.bf16.msra.mxu0 %v1990_v3 }
 0x4ce   :  { %1829 = vmatprep.subr.bf16.mxu0 %v2100_v23 }
 0x4d1   :  { %1830 = vmatpush3.bf16.msra.mxu0 %v1991_v57 }
 0x4d2   :  { %1831 = vmatprep.subr.bf16.mxu0 %v2100_v23 }
 0x4d5   :  { %1832 = vmatpush3.bf16.msra.mxu0 %v1992_v58 }
 0x4d6   :  { %1833 = vmatprep.subr.bf16.mxu0 %v2100_v23 }
 0x4d9   :  { %1834 = vmatpush3.bf16.msra.mxu0 %v1993_v18 }
 0x4da   :  { %1835 = vmatprep.subr.bf16.mxu0 %v2100_v23  ;;  %v1497_v23 = vld [vmem:[%s2649_s5 + $0x4] ss:$0 sm:$0xff] }
 0x4dd   :  { %1836 = vmatpush3.bf16.msra.mxu0 %v1994_v19 }
 0x4f0   :  { %v1372_v44 = vpop.xlane.xlu0 %1371 }
 0x4f1   :  { %v1373_v34 = vmul.f32 0.00390625, %v1372_v44 }
 0x4f3   :  { %v1375_v35 = vmul.f32 %v1374_v63, %v1373_v34 }
 0x4f4   :  { %v1396_v0 = vpop.xlane.xlu0 %1395 }
 0x4f5   :  { %v1397_v37 = vmul.f32 0.00390625, %v1396_v0 }
 0x4f7   :  { %v1384_v9 = vpop.xlane.xlu1 %1383  ;;  %v1399_v16 = vmul.f32 %v1398_v60, %v1397_v37 }
 0x4f8   :  { %v1385_v24 = vmul.f32 0.00390625, %v1384_v9 }
 0x4fa   :  { %v1387_v40 = vmul.f32 %v1386_v8, %v1385_v24 }
 0x590   :  { %v1723_v61 = vpop.f32.mrb[32].mxu1 }
 0x591   :  { %v1724_v62 = vpop.f32.mrb[33].mxu1 }
 0x592   :  { %v1725_v48 = vadd.f32 %v1724_v62, %v1723_v61  ;;  %v1726_v1 = vpop.f32.mrb[34].mxu1  ;;  %v1745_v10 = vpop.f32.mrb[16].mxu0 }
 0x593   :  { %v1727_v4 = vpop.f32.mrb[35].mxu1  ;;  %v1746_v5 = vpop.f32.mrb[17].mxu0 }
 0x594   :  { %v1316_v53 = vadd.f32 %v1725_v48, %v1088_v36  ;;  %v1747_v14 = vadd.f32 %v1746_v5, %v1745_v10  ;;  %v1748_v43 = vpop.f32.mrb[18].mxu0 }
 0x595   :  { %v1749_v21 = vpop.f32.mrb[19].mxu0 }
 0x596   :  { %v1356_v39 = vadd.f32 %v1747_v14, %v1316_v53 }
 0x598   :  { %v1376_v30 = vadd.f32 %v1375_v35, %v1356_v39 }
 0x59a   :  { %v1388_v15 = vadd.f32 %v1387_v40, %v1376_v30 }
 0x59c   :  { %v1400_v38 = vadd.f32 %v1399_v16, %v1388_v15 }
 0x59e   :  { %v1401_v42 = vmax.f32 %v1400_v38, 0.0 }
 0x5a0   :  { %v1402_v45 = vpack.c.bf16 %v1401_v42, %v1401_v42 }
 0x5a2   :  { %1818 = vmatmul.mubr.msk.bf16.vlgmr.msra.gmra.mrb[36].mxu1 %vm1007_vm3, %v1402_v45 }
 0x675   :  { %v1473_v22 = vpop.f32.mrb[36].mxu1 }
 0x676   :  { %v1474_v52 = vadd.f32 %v1473_v22, %v1411_v20  ;;  %v1819_v32 = vpop.f32.mrb[37].mxu1 }
 0x677   :  { %v1476_v41 = vpop.f32.mrb[38].mxu1 }
 0x678   :  { %v1479_v59 = vmax.f32 %v1474_v52, 0.0  ;;  %v1820_v33 = vpop.f32.mrb[39].mxu1 }
 0x67a   :  { %v1480_v46 = vpack.c.bf16 %v1479_v59, %v1479_v59 }
 0x67c   :  { %1838 = vmatmul.mubr.bf16.vlgmr.msra.gmra.mrb[20].mxu0 %v1480_v46 }
 0x74f   :  { %v1580_v13 = vpop.f32.mrb[20].mxu0 }
 0x750   :  { %v1581_v12 = vadd.f32 %v1580_v13, %v1497_v23  ;;  %v1839_v2 = vpop.f32.mrb[21].mxu0 }
 0x751   :  { %v1583_v6 = vpop.f32.mrb[22].mxu0 }
 0x752   :  { %1586 = vst [vmem:[#allocation2] sm:$0xf] %v1581_v12  ;;  %v1840_v11 = vpop.f32.mrb[23].mxu0 }
 0x753   :  { %2086 = shalt.err (!%p2083_p4)
}
 0x754   :  { %s2087_s5 = scalar_lea.hbm %s2650_s6, 64 }
 0x755   :  { %p2088_p5 = scmp.ne.s32.totalorder %s2650_s6, %s2087_s5  ;;  %p2091_p6 = scmp.lt.u32.totalorder %s2087_s5, %s2650_s6 }
 0x757   :  { %p2093_p7 = pnand %p2091_p6, %p2088_p5 }
 0x759   :  { %2096 = shalt.err (!%p2093_p7)
}
 0x75a   :  { %1596 = dma.vmem_to_hbm [thread:$0]  %s1594_s17, 64, %s2650_s6, [#allocation3]  }
 0x75b   :  { %2097 = dma.done.wait [#allocation3], 64  }
 0x75c   :  { %2098 = vsyncadd [#allocation3], 4294967232 }
 0x75d   :  { %1600 = vsyncpa [#allocation3], 1 }

</bundles_post_ra>
